<compile_context>
chip_gen: v7x
topology: tpu7x:2x2x1
jax: 0.10.0
libtpu: 0.0.40
codegen_flags: <defaults>
</compile_context>

<pallas_src>
import functools
import math

import jax
import jax.numpy as jnp
from jax.experimental import pallas as pl
from jax.experimental.pallas import tpu as pltpu


def _mhsa_kernel(x_ref, w_qkv_ref, b_qkv_ref, o_ref, *,
                 head_num, head_dim, compute_dtype, flat_out):
    bt, S, D_in = x_ref.shape
    H, d = head_num, head_dim
    D_out = H * d

    # ---- fused QKV projection (input proj + score scale already folded) ---
    # Flatten the batch tile so the MXU sees M = bt*S rows in one pass.
    xf = x_ref[...].reshape(bt * S, D_in).astype(compute_dtype)
    qkv = jnp.dot(xf, w_qkv_ref[...],
                  preferred_element_type=jnp.float32) + b_qkv_ref[...]

    # ---- pack heads into one batch axis: (bt*S, 3*D_out) -> (H*bt, S, d) ---
    def heads(base):
        cols = [qkv[:, base + h * d: base + (h + 1) * d].reshape(bt, S, d)
                for h in range(H)]
        return jnp.concatenate(cols, axis=0).astype(compute_dtype)

    q = heads(0)              # 1/sqrt(d) already folded into the Q weights
    k = heads(D_out)
    v = heads(2 * D_out)

    # ---- batched scaled-dot-product attention (single batch dim = H*bt) ---
    scores = jnp.einsum('bqd,bkd->bqk', q, k,
                        preferred_element_type=jnp.float32)      # (H*bt, S, S)
    scores = scores - jnp.max(scores, axis=-1, keepdims=True)
    p = jnp.exp(scores)
    p = p * pl.reciprocal(jnp.sum(p, axis=-1, keepdims=True), approx=True)
    ctx = jnp.einsum('bqk,bkd->bqd', p.astype(compute_dtype), v,
                     preferred_element_type=jnp.float32)         # (H*bt, S, d)

    # ---- re-pack heads along lanes and store once ---------------------
    out = jnp.concatenate([ctx[h * bt:(h + 1) * bt] for h in range(H)],
                          axis=-1)                               # (bt, S, H*d)
    if flat_out:
        # Single lane-dense store of the whole (bt, S*D_out) output slab.
        o_ref[...] = out.reshape(bt, S * D_out).astype(o_ref.dtype)
    else:
        o_ref[...] = out.astype(o_ref.dtype)


def _vmem_bytes(bt, S, D_in, D_out, head_num, w_itemsize):
    """Per-grid-step VMEM footprint estimate (bytes), incl. intermediates."""
    f32 = 4
    weights = 2 * (D_in * 3 * D_out * w_itemsize + 3 * D_out * f32)  # W/b (dbl-buf)
    io = 2 * bt * S * (D_in + D_out) * f32                           # x / out blocks
    x_cast = bt * S * D_in * w_itemsize
    proj = bt * S * 3 * D_out * (f32 + w_itemsize)                   # qkv f32 + bf16 head-packed
    attn = bt * head_num * S * S * (2 * f32 + w_itemsize)            # scores + exp + bf16 probs
    ctx = 2 * bt * S * D_out * f32                                   # ctx + packed output value
    return weights + io + x_cast + proj + attn + ctx


def _tpu_vmem_capacity():
    try:
        return int(pltpu.get_tpu_info().vmem_capacity_bytes)
    except Exception:
        return 64 * 1024 * 1024    # conservative: assume smallest (v7x) VMEM


def _pick_block_b(B, S, D_in, D_out, head_num, w_itemsize, budget, min_steps):
    """Largest divisor of B fitting the VMEM budget; keep >= min_steps steps."""
    divisors = [bt for bt in range(1, B + 1) if B % bt == 0]
    fits = [bt for bt in divisors
            if _vmem_bytes(bt, S, D_in, D_out, head_num, w_itemsize) <= budget]
    if not fits:
        fits = [1]
    pool = fits
    if min_steps > 1:            # v7x: 2 TensorCores -> want >= 2 grid steps
        capped = [bt for bt in fits if B // bt >= min_steps]
        if capped:
            pool = capped
    return max(pool)


def self_attention(x, params, *, head_num, head_dim,
                   compute_dtype=jnp.bfloat16, block_b=None):
    """x: (B, S, D_in) f32 -> (B, S, head_num*head_dim) f32.

    params = (wp, bp, wq, bq, wk, bk, wv, bv); weights stored (in, out) so a
    linear is y = x @ W + b.  If the module's input projection is Identity,
    pass wp = eye(D_out), bp = zeros((1, D_out)).
    """
    B, S, D_in = x.shape
    D_out = head_num * head_dim
    wp, bp, wq, bq, wk, bk, wv, bv = params

    # Fold the input projection and the 1/sqrt(head_dim) score scale into the
    # fused QKV weights/bias (one-time, host side).
    scale = 1.0 / math.sqrt(head_dim)
    w_qkv = jnp.concatenate([(wp @ wq) * scale, wp @ wk, wp @ wv], axis=1)
    b_qkv = jnp.concatenate(
        [(bp @ wq + bq) * scale, bp @ wk + bk, bp @ wv + bv], axis=1)
    w_qkv = w_qkv.astype(compute_dtype)     # bf16 MXU operands
    b_qkv = b_qkv.astype(jnp.float32)       # added after f32 accumulation

    w_itemsize = jnp.dtype(compute_dtype).itemsize
    vmem_cap = _tpu_vmem_capacity()
    if vmem_cap <= 64 * 1024 * 1024:         # v7x-class: 64 MiB VMEM, 2 TCs
        pick_budget, vmem_limit, min_steps = 40 << 20, 56 << 20, 2
    else:                                    # v5e / v6e: 128 MiB VMEM, 1 TC
        pick_budget, vmem_limit, min_steps = 96 << 20, 112 << 20, 1

    if block_b is None:
        block_b = _pick_block_b(B, S, D_in, D_out, head_num, w_itemsize,
                                pick_budget, min_steps)
    assert B % block_b == 0, "block_b must divide B"
    grid = (B // block_b,)

    cparams = pltpu.CompilerParams(dimension_semantics=("parallel",),
                                   vmem_limit_bytes=vmem_limit)

    def run(flat_out, single_buffer_w):
        kernel = functools.partial(
            _mhsa_kernel, head_num=head_num, head_dim=head_dim,
            compute_dtype=compute_dtype, flat_out=flat_out)
        if single_buffer_w:
            # Constant index_map -> one resident VMEM copy is enough.
            w_spec = pl.BlockSpec((D_in, 3 * D_out), lambda i: (0, 0),
                                  pipeline_mode=pl.Buffered(1))
            b_spec = pl.BlockSpec((1, 3 * D_out), lambda i: (0, 0),
                                  pipeline_mode=pl.Buffered(1))
        else:
            w_spec = pl.BlockSpec((D_in, 3 * D_out), lambda i: (0, 0))
            b_spec = pl.BlockSpec((1, 3 * D_out), lambda i: (0, 0))
        in_specs = [pl.BlockSpec((block_b, S, D_in), lambda i: (i, 0, 0)),
                    w_spec, b_spec]
        if flat_out:
            out_shape = jax.ShapeDtypeStruct((B, S * D_out), x.dtype)
            out_specs = pl.BlockSpec((block_b, S * D_out), lambda i: (i, 0))
        else:
            out_shape = jax.ShapeDtypeStruct((B, S, D_out), x.dtype)
            out_specs = pl.BlockSpec((block_b, S, D_out), lambda i: (i, 0, 0))
        out = pl.pallas_call(kernel, out_shape=out_shape, grid=grid,
                             in_specs=in_specs, out_specs=out_specs,
                             compiler_params=cparams)(x, w_qkv, b_qkv)
        return out.reshape(B, S, D_out)

    # The flattened lane-dense output needs the out block's second-minor dim
    # (block_b) to stay (8, .)-tile friendly.
    flat_ok = (block_b == B) or (block_b % 8 == 0)
    if flat_ok:
        try:
            return run(flat_out=True, single_buffer_w=True)
        except Exception:
            # This Mosaic build rejected the trailing-dim-collapse reshape or
            # single-buffered specs -- fall back to the proven 3-D layout.
            pass
    return run(flat_out=False, single_buffer_w=False)


def _reference(x, params, *, head_num, head_dim):
    """Pure-JAX reference mirroring the PyTorch forward exactly (f32)."""
    wp, bp, wq, bq, wk, bk, wv, bv = params
    B, S, _ = x.shape
    d_out = head_num * head_dim
    xp = x @ wp + bp
    q = (xp @ wq + bq).reshape(B, S, head_num, head_dim).transpose(0, 2, 1, 3)
    k = (xp @ wk + bk).reshape(B, S, head_num, head_dim).transpose(0, 2, 1, 3)
    v = (xp @ wv + bv).reshape(B, S, head_num, head_dim).transpose(0, 2, 1, 3)
    scores = jnp.einsum("bhqd,bhkd->bhqk", q, k) / math.sqrt(head_dim)
    w = jax.nn.softmax(scores, axis=-1)
    ctx = jnp.einsum("bhqk,bhkd->bhqd", w, v)
    return ctx.transpose(0, 2, 1, 3).reshape(B, S, d_out)


if __name__ == "__main__":
    # Small shapes consistent with the module:
    #   batch=2, seq=8, input_dim=32, head_num=4, head_dim=16 -> output_dim=64
    B, S, D_in = 2, 8, 32
    head_num, head_dim = 4, 16
    D_out = head_num * head_dim

    key = jax.random.PRNGKey(0)
    ks = jax.random.split(key, 9)
    x = jax.random.normal(ks[0], (B, S, D_in), dtype=jnp.float32)

    def lin_init(kw, kb, fan_in, fan_out):
        bound = 1.0 / math.sqrt(fan_in)
        w = jax.random.uniform(kw, (fan_in, fan_out), jnp.float32, -bound, bound)
        b = jax.random.uniform(kb, (1, fan_out), jnp.float32, -bound, bound)
        return w, b

    wp, bp = lin_init(ks[1], ks[2], D_in, D_out)   # input_proj (input_dim != output_dim)
    wq, bq = lin_init(ks[3], ks[4], D_out, D_out)
    wk, bk = lin_init(ks[5], ks[6], D_out, D_out)
    wv, bv = lin_init(ks[7], ks[8], D_out, D_out)
    params = (wp, bp, wq, bq, wk, bk, wv, bv)

    out = self_attention(x, params, head_num=head_num, head_dim=head_dim)
    out = jax.block_until_ready(out)

    ref = _reference(x, params, head_num=head_num, head_dim=head_dim)
    # Tolerance loosened for bf16 MXU operands + EUP approx reciprocal.
    if not jnp.allclose(out, ref, atol=2e-2, rtol=2e-2):
        raise AssertionError("Pallas kernel output mismatch vs reference")

    print("KERNEL_OK")
</pallas_src>

<mosaic_0001>
module attributes {stable_mosaic.version = 11 : i64} {
  func.func @_mhsa_kernel(%arg0: i32, %arg1: memref<1x8x32xf32, #tpu.memory_space<vmem>>, %arg2: memref<32x192xbf16, #tpu.memory_space<vmem>>, %arg3: memref<1x192xf32, #tpu.memory_space<vmem>>, %arg4: memref<1x8x64xf32, #tpu.memory_space<vmem>>) attributes {dimension_semantics = [#tpu.dimension_semantics<parallel>], iteration_bounds = array<i64: 2>, scalar_prefetch = 0 : i64, scratch_operands = 0 : i64, tpu.core_type = #tpu.core_type<tc>, window_params = [{transform_indices = @transform_0, window_bounds = array<i64: 1, 8, 32>}, {pipeline_mode = #tpu.pipeline_mode<synchronous>, transform_indices = @transform_1, window_bounds = array<i64: 32, 192>}, {pipeline_mode = #tpu.pipeline_mode<synchronous>, transform_indices = @transform_2, window_bounds = array<i64: 1, 192>}, {transform_indices = @transform_3, window_bounds = array<i64: 1, 8, 64>}]} {
    %c0 = arith.constant 0 : index
    %c0_0 = arith.constant 0 : index
    %c0_1 = arith.constant 0 : index
    %0 = vector.load %arg1[%c0, %c0_0, %c0_1] : memref<1x8x32xf32, #tpu.memory_space<vmem>>, vector<1x8x32xf32>
    %1 = vector.shape_cast %0 : vector<1x8x32xf32> to vector<8x32xf32>
    %2 = arith.truncf %1 : vector<8x32xf32> to vector<8x32xbf16>
    %c0_2 = arith.constant 0 : index
    %c0_3 = arith.constant 0 : index
    %3 = vector.load %arg2[%c0_2, %c0_3] : memref<32x192xbf16, #tpu.memory_space<vmem>>, vector<32x192xbf16>
    %cst = arith.constant dense<0.000000e+00> : vector<8x192xf32>
    %4 = tpu.matmul %2, %3, %cst {dimension_numbers = #tpu.dot_dimension_numbers<[1], [0], [0], [1], [0, 0, 1, 1], [], []>} : vector<8x32xbf16>, vector<32x192xbf16>, vector<8x192xf32> -> vector<8x192xf32>
    %c0_4 = arith.constant 0 : index
    %c0_5 = arith.constant 0 : index
    %5 = vector.load %arg3[%c0_4, %c0_5] : memref<1x192xf32, #tpu.memory_space<vmem>>, vector<1x192xf32>
    %6 = vector.broadcast %5 : vector<1x192xf32> to vector<8x192xf32>
    %7 = arith.addf %4, %6 : vector<8x192xf32>
    %8 = vector.extract_strided_slice %7 {offsets = [0, 0], sizes = [8, 16], strides = [1, 1]} : vector<8x192xf32> to vector<8x16xf32>
    %9 = vector.shape_cast %8 : vector<8x16xf32> to vector<1x8x16xf32>
    %10 = vector.extract_strided_slice %7 {offsets = [0, 16], sizes = [8, 16], strides = [1, 1]} : vector<8x192xf32> to vector<8x16xf32>
    %11 = vector.shape_cast %10 : vector<8x16xf32> to vector<1x8x16xf32>
    %12 = vector.extract_strided_slice %7 {offsets = [0, 32], sizes = [8, 16], strides = [1, 1]} : vector<8x192xf32> to vector<8x16xf32>
    %13 = vector.shape_cast %12 : vector<8x16xf32> to vector<1x8x16xf32>
    %14 = vector.extract_strided_slice %7 {offsets = [0, 48], sizes = [8, 16], strides = [1, 1]} : vector<8x192xf32> to vector<8x16xf32>
    %15 = vector.shape_cast %14 : vector<8x16xf32> to vector<1x8x16xf32>
    %16 = tpu.concatenate %9, %11, %13, %15 in 0 : vector<1x8x16xf32>, vector<1x8x16xf32>, vector<1x8x16xf32>, vector<1x8x16xf32> -> vector<4x8x16xf32>
    %17 = arith.truncf %16 : vector<4x8x16xf32> to vector<4x8x16xbf16>
    %18 = vector.extract_strided_slice %7 {offsets = [0, 64], sizes = [8, 16], strides = [1, 1]} : vector<8x192xf32> to vector<8x16xf32>
    %19 = vector.shape_cast %18 : vector<8x16xf32> to vector<1x8x16xf32>
    %20 = vector.extract_strided_slice %7 {offsets = [0, 80], sizes = [8, 16], strides = [1, 1]} : vector<8x192xf32> to vector<8x16xf32>
    %21 = vector.shape_cast %20 : vector<8x16xf32> to vector<1x8x16xf32>
    %22 = vector.extract_strided_slice %7 {offsets = [0, 96], sizes = [8, 16], strides = [1, 1]} : vector<8x192xf32> to vector<8x16xf32>
    %23 = vector.shape_cast %22 : vector<8x16xf32> to vector<1x8x16xf32>
    %24 = vector.extract_strided_slice %7 {offsets = [0, 112], sizes = [8, 16], strides = [1, 1]} : vector<8x192xf32> to vector<8x16xf32>
    %25 = vector.shape_cast %24 : vector<8x16xf32> to vector<1x8x16xf32>
    %26 = tpu.concatenate %19, %21, %23, %25 in 0 : vector<1x8x16xf32>, vector<1x8x16xf32>, vector<1x8x16xf32>, vector<1x8x16xf32> -> vector<4x8x16xf32>
    %27 = arith.truncf %26 : vector<4x8x16xf32> to vector<4x8x16xbf16>
    %28 = vector.extract_strided_slice %7 {offsets = [0, 128], sizes = [8, 16], strides = [1, 1]} : vector<8x192xf32> to vector<8x16xf32>
    %29 = vector.shape_cast %28 : vector<8x16xf32> to vector<1x8x16xf32>
    %30 = vector.extract_strided_slice %7 {offsets = [0, 144], sizes = [8, 16], strides = [1, 1]} : vector<8x192xf32> to vector<8x16xf32>
    %31 = vector.shape_cast %30 : vector<8x16xf32> to vector<1x8x16xf32>
    %32 = vector.extract_strided_slice %7 {offsets = [0, 160], sizes = [8, 16], strides = [1, 1]} : vector<8x192xf32> to vector<8x16xf32>
    %33 = vector.shape_cast %32 : vector<8x16xf32> to vector<1x8x16xf32>
    %34 = vector.extract_strided_slice %7 {offsets = [0, 176], sizes = [8, 16], strides = [1, 1]} : vector<8x192xf32> to vector<8x16xf32>
    %35 = vector.shape_cast %34 : vector<8x16xf32> to vector<1x8x16xf32>
    %36 = tpu.concatenate %29, %31, %33, %35 in 0 : vector<1x8x16xf32>, vector<1x8x16xf32>, vector<1x8x16xf32>, vector<1x8x16xf32> -> vector<4x8x16xf32>
    %37 = arith.truncf %36 : vector<4x8x16xf32> to vector<4x8x16xbf16>
    "tpu.trace_start"() <{level = 10 : i32, message = "bqd,bkd->bqk"}> : () -> ()
    %cst_6 = arith.constant dense<0.000000e+00> : vector<4x8x8xf32>
    %38 = tpu.matmul %17, %27, %cst_6 {dimension_numbers = #tpu.dot_dimension_numbers<[2], [2], [1], [1], [0, 0, 0, 1, 1, 1], [0], [0]>} : vector<4x8x16xbf16>, vector<4x8x16xbf16>, vector<4x8x8xf32> -> vector<4x8x8xf32>
    "tpu.trace_stop"() : () -> ()
    %cst_7 = arith.constant dense<0xFF800000> : vector<4x8xf32>
    %39 = vector.multi_reduction <maximumf>, %38, %cst_7 [2] : vector<4x8x8xf32> to vector<4x8xf32>
    %40 = vector.shape_cast %39 : vector<4x8xf32> to vector<4x8x1xf32>
    %41 = vector.broadcast %40 : vector<4x8x1xf32> to vector<4x8x8xf32>
    %42 = arith.subf %38, %41 : vector<4x8x8xf32>
    %43 = math.exp %42 : vector<4x8x8xf32>
    %cst_8 = arith.constant dense<0.000000e+00> : vector<4x8xf32>
    %44 = vector.multi_reduction <add>, %43, %cst_8 [2] : vector<4x8x8xf32> to vector<4x8xf32>
    %45 = vector.shape_cast %44 : vector<4x8xf32> to vector<4x8x1xf32>
    %46 = tpu.reciprocal %45 {approx = true} : vector<4x8x1xf32> -> vector<4x8x1xf32>
    %47 = vector.broadcast %46 : vector<4x8x1xf32> to vector<4x8x8xf32>
    %48 = arith.mulf %43, %47 : vector<4x8x8xf32>
    %49 = arith.truncf %48 : vector<4x8x8xf32> to vector<4x8x8xbf16>
    "tpu.trace_start"() <{level = 10 : i32, message = "bqk,bkd->bqd"}> : () -> ()
    %cst_9 = arith.constant dense<0.000000e+00> : vector<4x8x16xf32>
    %50 = tpu.matmul %49, %37, %cst_9 {dimension_numbers = #tpu.dot_dimension_numbers<[2], [1], [1], [2], [0, 0, 0, 1, 1, 2], [0], [0]>} : vector<4x8x8xbf16>, vector<4x8x16xbf16>, vector<4x8x16xf32> -> vector<4x8x16xf32>
    "tpu.trace_stop"() : () -> ()
    %51 = vector.extract_strided_slice %50 {offsets = [0, 0, 0], sizes = [1, 8, 16], strides = [1, 1, 1]} : vector<4x8x16xf32> to vector<1x8x16xf32>
    %52 = vector.extract_strided_slice %50 {offsets = [1, 0, 0], sizes = [1, 8, 16], strides = [1, 1, 1]} : vector<4x8x16xf32> to vector<1x8x16xf32>
    %53 = vector.extract_strided_slice %50 {offsets = [2, 0, 0], sizes = [1, 8, 16], strides = [1, 1, 1]} : vector<4x8x16xf32> to vector<1x8x16xf32>
    %54 = vector.extract_strided_slice %50 {offsets = [3, 0, 0], sizes = [1, 8, 16], strides = [1, 1, 1]} : vector<4x8x16xf32> to vector<1x8x16xf32>
    %55 = tpu.concatenate %51, %52, %53, %54 in 2 : vector<1x8x16xf32>, vector<1x8x16xf32>, vector<1x8x16xf32>, vector<1x8x16xf32> -> vector<1x8x64xf32>
    %c0_10 = arith.constant 0 : index
    %c0_11 = arith.constant 0 : index
    %c0_12 = arith.constant 0 : index
    %56 = vector.load %arg4[%c0_10, %c0_11, %c0_12] : memref<1x8x64xf32, #tpu.memory_space<vmem>>, vector<1x8x64xf32>
    tpu.vector_store %arg4[%c0_10, %c0_11, %c0_12], %55 {strides = array<i32>} : memref<1x8x64xf32, #tpu.memory_space<vmem>>, vector<1x8x64xf32>,
    return
  }
  func.func @transform_0(%arg0: i32) -> (i32, i32, i32) {
    %c0_i32 = arith.constant 0 : i32
    %c0_i32_0 = arith.constant 0 : i32
    %c0_i32_1 = arith.constant 0 : i32
    return %arg0, %c0_i32, %c0_i32_0 : i32, i32, i32
  }
  func.func @transform_1(%arg0: i32) -> (i32, i32) {
    %c0_i32 = arith.constant 0 : i32
    %c0_i32_0 = arith.constant 0 : i32
    %c0_i32_1 = arith.constant 0 : i32
    return %c0_i32, %c0_i32_0 : i32, i32
  }
  func.func @transform_2(%arg0: i32) -> (i32, i32) {
    %c0_i32 = arith.constant 0 : i32
    %c0_i32_0 = arith.constant 0 : i32
    %c0_i32_1 = arith.constant 0 : i32
    return %c0_i32, %c0_i32_0 : i32, i32
  }
  func.func @transform_3(%arg0: i32) -> (i32, i32, i32) {
    %c0_i32 = arith.constant 0 : i32
    %c0_i32_0 = arith.constant 0 : i32
    %c0_i32_1 = arith.constant 0 : i32
    return %arg0, %c0_i32, %c0_i32_0 : i32, i32, i32
  }
}

</mosaic_0001>

<bundles_post_ra>
// kernel: tpu_custom_call.1
= control target key start
LH: loop header
LB: loop body
LE: loop exit
PB: predicated region body
PF: predicated region fallthrough
CT: control target
= control target key end

     0   :  { %8 = vsyncpa [#allocation3], 0  ;;  %s1470_s0 = inlined_call_operand.hbm [shape: f32[2,8,32], index: 0, kind: input, shape index: {}]   ;;  %s1471_s1 = inlined_call_operand.hbm [shape: bf16[32,192], index: 1, kind: input, shape index: {}]   ;;  %s1472_s2 = inlined_call_operand.vmem [shape: f32[1,192], index: 2, kind: input, shape index: {}]   ;;  %s1473_s3 = inlined_call_operand.hbm [shape: f32[2,8,64], index: 3, kind: output, shape index: {}]  }
   0x1   :  { %10 = vsyncpa [#allocation3 + $0x1], 0 }
   0x2   :  { %11 = vsyncpa [#allocation6], 0 }
   0x3   :  { %12 = vsyncpa [#allocation4], 0 }
   0x4   :  { %14 = vsyncpa [#allocation4 + $0x1], 0  ;;  %s1203_s12 = smov 0   ;;  %s1205_s13 = smov 0  }
   0x5   :  { %s1207_s14 = smov 0   ;;  %s1209_s15 = smov 0  }
   0x6 LB: > { %s1224_s16 = sadd.s32 4294967295, %s1166_s15   ;;  %s856_s17 = sadd.s32 4294967294, %s1166_s15   ;;  %s1166_s15 = sphi %s1209_s15, %s1493_s15   ;;  %s1162_s14 = sphi %s1207_s14, %s1492_s14   ;;  %s1158_s13 = sphi %s1205_s13, %s1491_s13   ;;  %s1154_s12 = sphi %s1203_s12, %s1490_s12  }
   0x7   : > { %p40_p0 = scmp.ne.s32.totalorder %s1158_s13, %s1154_s12  ;;  %p1474_p1 = scmp.eq.s32.totalorder %s1224_s16, 0 }
   0x8   : > { %p112_p3 = scmp.eq.s32.totalorder %s856_s17, 1  ;;  %p857_p5 = scmp.ge.s32.totalorder %s1166_s15, 1 }
   0x9   : > { %p1233_p4 = por %p1474_p1, %p40_p0  ;;  %p119_p7 = scmp.lt.s32.totalorder %s1166_s15, 3 }
   0xa   : > { %p1238_p6 = por %p112_p3, %p40_p0  ;;  %s1168_s21 = smov [#allocation5]  }
   0xb   : > { %s1477_s18 = scalar_select %p1233_p4, 1, 0 }
   0xc   : > { %s1478_s19 = scalar_select %p1238_p6, 1, 0 }
   0xd   : > { %p1243_p8 = pnand %p857_p5, %p119_p7  ;;  %s131_s22 = sshll.u32 %s1168_s21, 4  ;;  %s1247_s22 = int_to_ptr.vmem [resolvable:$true] %s131_s22 }
   0xe   : > { %s1259_s24 = sadd.s32 1, %s1166_s15   ;;  %s27_s25 = sadd.s32 1, %s1162_s14 }
   0xf   : > { %s1479_s20 = scalar_select %p1243_p8, 1, 0 }
  0x10   : > { %p955_p9 = pneg %p1243_p8  ;;  %s24_s26 = ssub.s32 %s1166_s15, %s1259_s24 }
  0x11   : > { %s1038_s29 = scalar_lea.hbm %s1471_s1, 512 }
  0x12   : > { %p1254_p11 = pnand %p955_p9, %p1474_p1  ;;  %p1039_p12 = scmp.ne.s32.totalorder %s1471_s1, %s1038_s29 }
  0x13   : > { %p1045_p5 = scmp.lt.u32.totalorder %s1038_s29, %s1471_s1 }
  0x14   : > { %p1040_p13 = pneg %p1254_p11 }
  0x16   : > { %p1041_p0 = pnand %p1040_p13, %p1039_p12 }
  0x18   : > { %p1042_p3 = pneg %p1041_p0 }
  0x1a   : > { %p1047_p7 = pnand %p1045_p5, %p1042_p3 }
  0x1c   : > { %1050 = shalt.err (!%p1047_p7)
}
  0x1d   : > { %s1051_s7 = scalar_lea.vmem %s1247_s22, 512  ;;  %p1059_p2 = scmp.lt.s32.totalorder %s1247_s22, %s1247_s22 }
  0x1e   : > { %p1052_p9 = scmp.ne.s32.totalorder %s1247_s22, %s1051_s7  ;;  %p1060_p6 = scmp.lt.s32.totalorder %s1051_s7, %s1051_s7 }
  0x20   : > { %p1054_p10 = pnand %p1052_p9, %p1040_p13  ;;  %p1061_p4 = por %p1060_p6, %p1059_p2 }
  0x22   : > { %p1055_p1 = pneg %p1054_p10 }
  0x24   : > { %p1062_p8 = pnand %p1061_p4, %p1055_p1 }
  0x26   : > { %1065 = shalt.err (!%p1062_p8)
}
  0x27   : > { %s1169_s8 = smov 128   ;;  %s1170_s9 = smov 8  }
  0x28   : > { %958 = dma.hbm_to_vmem [thread:$0]  (!%p1254_p11), %s1471_s1, 512, %s1247_s22, [#allocation6], %s1169_s8, %s1169_s8, %s1170_s9  }
  0x29   : > { %p25_p2 = scmp.eq.s32.totalorder %s24_s26, 0  ;;  %p34_p1 = scmp.ne.s32.totalorder %s1162_s14, %s1158_s13 }
  0x2a   : > { %p35_p4 = scmp.eq.s32.totalorder %s1166_s15, 0  ;;  %p968_p6 = scmp.lt.s32.totalorder %s1166_s15, 2 }
  0x2b   : > { %s1290_s17 = scalar_select %p25_p2, %s1162_s14, %s27_s25  }
  0x2c   : > { %p36_p8 = por %p35_p4, %p34_p1  ;;  %p1481_p10 = scmp.eq.s32.totalorder %s1224_s16, 1 }
  0x2d   : > { %s148_s27 = sand.u32 1, %s1162_s14   ;;  %s861_s28 = sshll.u32 %s1166_s15, 7 }
  0x2e   : > { %p1294_p12 = por %p1481_p10, %p34_p1  ;;  %s860_s29 = sshll.u32 %s148_s27, 3 }
  0x2f   : > { %s1303_s4 = scalar_lea.hbm %s1470_s0, %s861_s28  ;;  %s152_s22 = scalar_lea.vmem [#allocation2], %s860_s29 }
  0x30   : > { %s159_s25 = sshll.u32 %s152_s22, 4  ;;  %p1305_p11 = pnand %p968_p6, %p36_p8  ;;  %s1309_s25 = int_to_ptr.vmem [resolvable:$true] %s159_s25 }
  0x31   : > { %s149_s5 = scalar_lea.sflag [#allocation3], %s148_s27  ;;  %s1066_s6 = scalar_lea.hbm %s1303_s4, 128 }
  0x32   : > { %p1067_p13 = scmp.ne.s32.totalorder %s1303_s4, %s1066_s6  ;;  %p1068_p0 = pneg %p1305_p11 }
  0x33   : > { %s1071_s9 = scalar_lea.hbm %s1470_s0, 256  ;;  %p1072_p7 = scmp.lt.u32.totalorder %s1303_s4, %s1470_s0 }
  0x34   : > { %p1069_p3 = pnand %p1068_p0, %p1067_p13  ;;  %p1073_p9 = scmp.lt.u32.totalorder %s1071_s9, %s1066_s6 }
  0x35   : > { %p1075_p1 = scmp.lt.u32.totalorder %s1066_s6, %s1303_s4 }
  0x36   : > { %p1070_p5 = pneg %p1069_p3  ;;  %p1074_p2 = por %p1073_p9, %p1072_p7 }
  0x38   : > { %p1076_p4 = por %p1075_p1, %p1074_p2 }
  0x3a   : > { %p1077_p6 = pnand %p1076_p4, %p1070_p5 }
  0x3c   : > { %1080 = shalt.err (!%p1077_p6)
}
  0x3d   : > { %s1081_s27 = scalar_lea.vmem %s1309_s25, 128  ;;  %s1171_s28 = smov [#allocation2]  }
  0x3e   : > { %p1082_p8 = scmp.ne.s32.totalorder %s1309_s25, %s1081_s27  ;;  %s1086_s29 = sshll.u32 %s1171_s28, 4  ;;  %s1087_s29 = int_to_ptr.vmem [resolvable:$false] %s1086_s29 }
  0x3f   : > { %s1088_s23 = scalar_lea.vmem %s1087_s29, 256  ;;  %p1089_p3 = scmp.lt.s32.totalorder %s1309_s25, %s1087_s29 }
  0x40   : > { %p1084_p10 = pnand %p1082_p8, %p1068_p0  ;;  %p1090_p7 = scmp.lt.s32.totalorder %s1088_s23, %s1081_s27 }
  0x42   : > { %p1085_p13 = pneg %p1084_p10  ;;  %p1091_p9 = por %p1090_p7, %p1089_p3 }
  0x44   : > { %p1092_p2 = pnand %p1091_p9, %p1085_p13 }
  0x46   : > { %1095 = shalt.err (!%p1092_p2)
}
  0x47   : > { %962 = dma.hbm_to_vmem [thread:$0]  (!%p1305_p11), %s1303_s4, 128, %s1309_s25, %s149_s5  }
  0x48   : > { %p1484_p5 = scmp.ne.s32.totalorder %s1479_s20, 0 }
  0x49   : > { %s1339_s30 = sand.u32 (!%p1484_p5), 1, %s1158_s13   ;;  %p1485_p0 = scmp.ne.s32.totalorder (!%p1484_p5), %s1477_s18, 0 }
  0x4a   : > { %168 = sbr.rel (%p1484_p5) target bundleno = 1471 (0x5bf), region = 32  ;;  %s863_s22 = sshll.u32 (!%p1484_p5), %s1339_s30, 3 }
  0x4b   : > { %s171_s6 = scalar_lea.sflag (!%p1484_p5), [#allocation3], %s1339_s30  ;;  %s174_s7 = scalar_lea.vmem (!%p1484_p5), [#allocation2], %s863_s22 }
  0x51   : > { %1141 = dma.done.wait (%p1485_p0), %s171_s6, 128  }
  0x52   : > { %1143 = vsyncadd (%p1485_p0), %s171_s6, 4294967168  ;;  %p1486_p11 = scmp.eq.s32.totalorder %s1224_s16, 0 }
  0x54   : > { %1145 = dma.done.wait (%p1486_p11), [#allocation6], 512   ;;  %p1487_p1 = pmov %p1486_p11 }
  0x55   : > { %v1172_v0 = vmov 0   ;;  %v1016_v1 = vld [vmem:[#allocation5 + $0x4] ss:$8 sps:$4 sm:$0xff]   ;;  %v1018_v2 = vld [vmem:[#allocation5] ss:$8 sps:$4 sm:$0xff]   ;;  %v202_v5 = vld [vmem:[%s174_s7] sm:$0xff]  ;;  %v210_v7 = vlaneseq }
  0x56   : > { %1147 = vsyncadd (%p1487_p1), [#allocation6], 4294966784  ;;  %276 = vmatprep.mubr.bf16.mxu0 %v1172_v0  ;;  %244 = vmatprep.subr.bf16.mxu0 %v1016_v1  ;;  %v1019_v3 = vld [vmem:[#allocation5 + $0x14] ss:$8 sps:$4 sm:$0xff]   ;;  %v1021_v4 = vld [vmem:[#allocation5 + $0x10] ss:$8 sps:$4 sm:$0xff]   ;;  %v203_v6 = vpack.c.bf16 %v202_v5, %v202_v5 }
  0x57   : > { %245 = vmatpush1.bf16.msra.mxu0 %v1018_v2  ;;  %vm240_vm0 = vcmask 261120   ;;  %v211_v8 = vshrl.u32 %v210_v7, 7  ;;  %v208_v10 = vld [vmem:[%s1472_s2] sm:$0x3]  ;;  %v1173_v11 = vmov 0.0   ;;  %vm1174_vm1 = vmmov 0  }
  0x58   : > { %246 = vmatprep.subr.bf16.mxu0 %v1019_v3  ;;  %899 = vmatprep.subr.bf16.mxu1 %v1173_v11  ;;  %s1175_s4 = smov 80   ;;  %s1176_s25 = smov 112   ;;  %vm316_vm2 = vcmask 130048   ;;  %vm562_vm3 = vcmask 1043456   ;;  %vm510_vm4 = vcmask 64512   ;;  %vm758_vm5 = vcmask 392192  }
  0x59   : > { %v212_v9 = vsub.s32 0, %v211_v8  ;;  %901 = vmatprep.mubr.msk.bf16.mxu1 %vm1174_vm1, %v1173_v11  ;;  %s1177_s26 = smov 96   ;;  %s1178_s5 = smov 64   ;;  %v216_v27 = vsub.s32 1, %v211_v8  ;;  %vm760_vm6 = vcmask 523264  }
  0x5a   : > { %s1179_s8 = smov 16   ;;  %s1180_s9 = smov 32  }
  0x5b   : > { %247 = vmatpush1.bf16.msra.mxu0 %v1021_v4  ;;  %v213_v12 = vrot.slane %v208_v10, %v212_v9  ;;  %v217_v29 = vrot.slane %v208_v10, %v216_v27  ;;  %s1181_s10 = smov 48   ;;  %s880_s11 = sshll.u32 %s1224_s16, 7 }
  0x5c   : > { %905 = vmatprep.subr.bf16.mxu0 %v1173_v11  ;;  %s200_s27 = scalar_lea.vmem [#allocation7], %s863_s22  ;;  %s1426_s6 = scalar_lea.hbm %s1473_s3, %s880_s11 }
  0x5d   : > { %s776_s28 = sshll.u32 %s200_s27, 4  ;;  %s763_s16 = scalar_lea.sflag [#allocation4], %s1339_s30  ;;  %s1428_s28 = int_to_ptr.vmem [resolvable:$true] %s776_s28 }
  0x5e   : > { %870 = vmatmul.mubr.msk.bf16.vlgmr.msra.gmra.mrb[0].mxu0 %vm240_vm0, %v203_v6  ;;  %s1096_s22 = scalar_lea.vmem %s1428_s28, 128  ;;  %s1182_s7 = smov [#allocation7]  }
  0x5f   : > { %907 = vmatprep.mubr.msk.bf16.mxu0 %vm1174_vm1, %v1173_v11  ;;  %p1097_p4 = scmp.ne.s32.totalorder %s1428_s28, %s1096_s22  ;;  %s1100_s18 = sshll.u32 %s1182_s7, 4  ;;  %s1101_s18 = int_to_ptr.vmem [resolvable:$false] %s1100_s18 }
  0x60   : > { %s1102_s20 = scalar_lea.vmem %s1101_s18, 256  ;;  %p1103_p10 = scmp.lt.s32.totalorder %s1428_s28, %s1101_s18 }
  0x61   : > { %p1098_p6 = pnand %p1097_p4, %p1294_p12  ;;  %p1104_p13 = scmp.lt.s32.totalorder %s1102_s20, %s1096_s22 }
  0x63   : > { %p1099_p8 = pneg %p1098_p6  ;;  %p1105_p3 = por %p1104_p13, %p1103_p10 }
  0x65   : > { %p1106_p7 = pnand %p1105_p3, %p1099_p8 }
 0x131   : > { %v278_v13 = vpop.f32.mrb[0].mxu0 }
 0x132   : > { %v279_v14 = vadd.f32 %v278_v13, %v213_v12  ;;  %v280_v15 = vpop.f32.mrb[1].mxu0 }
 0x133   : > { %v282_v16 = vpop.f32.mrb[2].mxu0  ;;  %v1373_v32 = vadd.f32 %v280_v15, %v217_v29 }
 0x134   : > { %v283_v17 = vpop.f32.mrb[3].mxu0  ;;  %292 = vrot.lane.b32.xlu1 %v279_v14, %s1175_s4  ;;  %286 = vrot.lane.b32.xlu0 %v279_v14, %s1176_s25  ;;  %v295_v18 = vpack.c.bf16 %v279_v14, %v279_v14 }
 0x135   : > { %v309_v36 = vpack.c.bf16 %v1373_v32, %v1373_v32 }
 0x137   : > { %v564_v37 = vsel %vm562_vm3, %v309_v36, 0 }
 0x138   : > { %289 = vrot.lane.b32.xlu0 %v279_v14, %s1177_s26  ;;  %314 = vrot.lane.b32.xlu1 %v295_v18, %s1178_s5 }
 0x1a6   : > { %v293_v19 = vpop.permute.xlu1 %292  ;;  %v287_v20 = vpop.permute.xlu0 %286 }
 0x1a7   : > { %v296_v21 = vpack.c.bf16 %v287_v20, %v287_v20  ;;  %v298_v24 = vpack.c.bf16 %v293_v19, %v293_v19 }
 0x1a9   : > { %364 = vrot.lane.b32.xlu0 %v296_v21, %s1178_s5 }
 0x1aa   : > { %v290_v22 = vpop.permute.xlu0 %289  ;;  %v315_v23 = vpop.permute.xlu1 %314 }
 0x1ab   : > { %v297_v25 = vpack.c.bf16 %v290_v22, %v290_v22  ;;  %v321_v26 = vsel %vm316_vm2, %v315_v23, 0 }
 0x1ac   : > { %900 = vmatpush3.bf16.xpose.msra.mxu1 %v321_v26 }
 0x1ad   : > { %462 = vrot.lane.b32.xlu0 %v298_v24, %s1178_s5  ;;  %413 = vrot.lane.b32.xlu1 %v297_v25, %s1178_s5 }
 0x1ae   : > { %911 = vmatprep.subr.bf16.mxu1 %v1173_v11 }
 0x1b3   : > { %902 = vmatmul.mubr.msk.bf16.vlgmr.msra.gmra.mrb[0].mxu1 %vm316_vm2, %v295_v18 }
 0x1b4   : > { %913 = vmatprep.mubr.msk.bf16.mxu1 %vm1174_vm1, %v1173_v11 }
 0x21b   : > { %v365_v28 = vpop.permute.xlu0 %364 }
 0x21c   : > { %v370_v30 = vsel %vm316_vm2, %v365_v28, 0 }
 0x21d   : > { %906 = vmatpush3.bf16.xpose.msra.mxu0 %v370_v30 }
 0x21e   : > { %917 = vmatprep.subr.bf16.mxu0 %v1173_v11 }
 0x21f   : > { %v414_v31 = vpop.permute.xlu1 %413  ;;  %v463_v34 = vpop.permute.xlu0 %462 }
 0x220   : > { %v419_v33 = vsel %vm316_vm2, %v414_v31, 0  ;;  %v468_v35 = vsel %vm316_vm2, %v463_v34, 0 }
 0x221   : > { %912 = vmatpush3.bf16.xpose.msra.mxu1 %v419_v33 }
 0x222   : > { %923 = vmatprep.subr.bf16.mxu1 %v1173_v11 }
 0x224   : > { %908 = vmatmul.mubr.msk.bf16.vlgmr.msra.gmra.mrb[4].mxu0 %vm316_vm2, %v296_v21 }
 0x225   : > { %918 = vmatpush3.bf16.xpose.msra.mxu0 %v468_v35  ;;  %919 = vmatprep.mubr.msk.bf16.mxu0 %vm1174_vm1, %v1173_v11 }
 0x226   : > { %929 = vmatprep.subr.bf16.mxu0 %v1173_v11 }
 0x228   : > { %914 = vmatmul.mubr.msk.bf16.vlgmr.msra.gmra.mrb[4].mxu1 %vm316_vm2, %v297_v25 }
 0x229   : > { %924 = vmatpush3.bf16.msra.mxu1 %v564_v37  ;;  %925 = vmatprep.mubr.msk.bf16.mxu1 %vm1174_vm1, %v1173_v11 }
 0x22a   : > { %935 = vmatprep.subr.bf16.mxu1 %v1173_v11 }
 0x22c   : > { %920 = vmatmul.mubr.msk.bf16.vlgmr.msra.gmra.mrb[8].mxu0 %vm316_vm2, %v298_v24 }
 0x22d   : > { %931 = vmatprep.mubr.msk.bf16.mxu0 %vm1174_vm1, %v1173_v11 }
 0x286   : > { %v357_v38 = vpop.f32.mrb[0].mxu1 }
 0x287   : > { %v903_v39 = vpop.f32.mrb[1].mxu1  ;;  %v511_v40 = vsel %vm510_vm4, %v357_v38, -inf }
 0x288   : > { %512 = vmax.xlane.f32.xlu1 %v511_v40  ;;  %v360_v41 = vpop.f32.mrb[2].mxu1 }
 0x289   : > { %v904_v42 = vpop.f32.mrb[3].mxu1 }
 0x2f7   : > { %v406_v43 = vpop.f32.mrb[4].mxu0 }
 0x2f8   : > { %v909_v44 = vpop.f32.mrb[5].mxu0  ;;  %v514_v45 = vsel %vm510_vm4, %v406_v43, -inf }
 0x2f9   : > { %515 = vmax.xlane.f32.xlu0 %v514_v45  ;;  %v409_v46 = vpop.f32.mrb[6].mxu0 }
 0x2fa   : > { %v910_v47 = vpop.f32.mrb[7].mxu0 }
 0x2fb   : > { %v455_v48 = vpop.f32.mrb[4].mxu1 }
 0x2fc   : > { %v915_v49 = vpop.f32.mrb[5].mxu1  ;;  %v517_v50 = vsel %vm510_vm4, %v455_v48, -inf }
 0x2fd   : > { %518 = vmax.xlane.f32.xlu0 %v517_v50  ;;  %v458_v51 = vpop.f32.mrb[6].mxu1 }
 0x2fe   : > { %v916_v52 = vpop.f32.mrb[7].mxu1 }
 0x2ff   : > { %v504_v53 = vpop.f32.mrb[8].mxu0 }
 0x300   : > { %v921_v54 = vpop.f32.mrb[9].mxu0  ;;  %v520_v55 = vsel %vm510_vm4, %v504_v53, -inf }
 0x301   : > { %v507_v56 = vpop.f32.mrb[10].mxu0  ;;  %521 = vmax.xlane.f32.xlu1 %v520_v55 }
 0x302   : > { %v922_v57 = vpop.f32.mrb[11].mxu0 }
 0x315   : > { %v513_v58 = vpop.xlane.xlu1 %512 }
 0x316   : > { %v523_v59 = vsub.f32 %v357_v38, %v513_v58 }
 0x318   : > { %v527_v60 = vmul.f32 1.442695, %v523_v59 }
 0x31a   : > { %1022 = vpow2.f32 %v527_v60 }
 0x324   : > { %v1023_v61 = vpop.eup %1022 }
 0x325   : > { %v535_v62 = vsel %vm510_vm4, %v1023_v61, 0.0 }
 0x326   : > { %536 = vadd.xlane.f32.xlu0 %v535_v62 }
 0x386   : > { %v516_v63 = vpop.xlane.xlu0 %515 }
 0x387   : > { %v524_v0 = vsub.f32 %v406_v43, %v516_v63 }
 0x389   : > { %v529_v1 = vmul.f32 1.442695, %v524_v0 }
 0x38a   : > { %v519_v2 = vpop.xlane.xlu0 %518 }
 0x38b   : > { %1024 = vpow2.f32 %v529_v1  ;;  %v525_v3 = vsub.f32 %v455_v48, %v519_v2 }
 0x38d   : > { %v531_v4 = vmul.f32 1.442695, %v525_v3 }
 0x38e   : > { %v522_v9 = vpop.xlane.xlu1 %521 }
 0x38f   : > { %1026 = vpow2.f32 %v531_v4  ;;  %v526_v12 = vsub.f32 %v504_v53, %v522_v9 }
 0x391   : > { %v533_v13 = vmul.f32 1.442695, %v526_v12 }
 0x395   : > { %v1025_v5 = vpop.eup %1024 }
 0x396   : > { %v538_v6 = vsel %vm510_vm4, %v1025_v5, 0.0 }
 0x397   : > { %539 = vadd.xlane.f32.xlu1 %v538_v6 }
 0x399   : > { %v1027_v7 = vpop.eup %1026 }
 0x39a   : > { %v541_v8 = vsel %vm510_vm4, %v1027_v7, 0.0 }
 0x39b   : > { %542 = vadd.xlane.f32.xlu0 %v541_v8 }
 0x3a8   : > { %303 = vrot.lane.b32.xlu1 %v1373_v32, %s1177_s26 }
 0x3b1   : > { %300 = vrot.lane.b32.xlu0 %v1373_v32, %s1176_s25 }
 0x3b3   : > { %v537_v10 = vpop.xlane.xlu0 %536 }
 0x3b4   : > { %1028 = vrcp.f32 %v537_v10 }
 0x3b5   : > { %1030 = vpow2.f32 %v533_v13 }
 0x3be   : > { %v1029_v14 = vpop.eup %1028 }
 0x3bf   : > { %v551_v15 = vmul.f32 %v1029_v14, %v1023_v61  ;;  %v1031_v17 = vpop.eup %1030 }
 0x3c0   : > { %v544_v18 = vsel %vm510_vm4, %v1031_v17, 0.0 }
 0x3c1   : > { %v555_v16 = vpack.c.bf16 %v551_v15, %v551_v15 }
 0x3c3   : > { %926 = vmatmul.mubr.msk.bf16.vlgmr.msra.gmra.mrb[8].mxu1 %vm510_vm4, %v555_v16 }
 0x3c4   : > { %937 = vmatprep.mubr.msk.bf16.mxu1 %vm1174_vm1, %v1173_v11 }
 0x3cc   : > { %545 = vadd.xlane.f32.xlu1 %v544_v18 }
 0x3dd   : > { %306 = vrot.lane.b32.xlu1 %v1373_v32, %s1175_s4 }
 0x424   : > { %v540_v19 = vpop.xlane.xlu1 %539 }
 0x425   : > { %1032 = vrcp.f32 %v540_v19 }
 0x428   : > { %v543_v20 = vpop.xlane.xlu0 %542  ;;  %v304_v21 = vpop.permute.xlu1 %303 }
 0x429   : > { %1034 = vrcp.f32 %v543_v20  ;;  %v311_v22 = vpack.c.bf16 %v304_v21, %v304_v21 }
 0x42b   : > { %v656_v23 = vsel %vm562_vm3, %v311_v22, 0 }
 0x42c   : > { %v301_v24 = vpop.permute.xlu0 %300  ;;  %936 = vmatpush3.bf16.msra.mxu1 %v656_v23 }
 0x42d   : > { %v310_v25 = vpack.c.bf16 %v301_v24, %v301_v24 }
 0x42f   : > { %v1033_v26 = vpop.eup %1032  ;;  %v610_v27 = vsel %vm562_vm3, %v310_v25, 0 }
 0x430   : > { %v552_v28 = vmul.f32 %v1033_v26, %v1025_v5  ;;  %930 = vmatpush3.bf16.msra.mxu0 %v610_v27 }
 0x431   : > { %941 = vmatprep.subr.bf16.mxu0 %v1173_v11 }
 0x432   : > { %v556_v29 = vpack.c.bf16 %v552_v28, %v552_v28 }
 0x433   : > { %v1035_v30 = vpop.eup %1034 }
 0x434   : > { %v553_v31 = vmul.f32 %v1035_v30, %v1027_v7  ;;  %932 = vmatmul.mubr.msk.bf16.vlgmr.msra.gmra.mrb[12].mxu0 %vm510_vm4, %v556_v29 }
 0x435   : > { %943 = vmatprep.mubr.msk.bf16.mxu0 %vm1174_vm1, %v1173_v11 }
 0x436   : > { %v557_v32 = vpack.c.bf16 %v553_v31, %v553_v31 }
 0x438   : > { %938 = vmatmul.mubr.msk.bf16.vlgmr.msra.gmra.mrb[12].mxu1 %vm510_vm4, %v557_v32 }
 0x459   : > { %v546_v33 = vpop.xlane.xlu1 %545 }
 0x45a   : > { %1036 = vrcp.f32 %v546_v33 }
 0x45d   : > { %v307_v34 = vpop.permute.xlu1 %306 }
 0x45e   : > { %v312_v35 = vpack.c.bf16 %v307_v34, %v307_v34 }
 0x460   : > { %v702_v36 = vsel %vm562_vm3, %v312_v35, 0 }
 0x461   : > { %942 = vmatpush3.bf16.msra.mxu0 %v702_v36 }
 0x464   : > { %v1037_v37 = vpop.eup %1036 }
 0x465   : > { %v554_v38 = vmul.f32 %v1037_v37, %v1031_v17 }
 0x467   : > { %v558_v39 = vpack.c.bf16 %v554_v38, %v554_v38 }
 0x469   : > { %944 = vmatmul.mubr.msk.bf16.vlgmr.msra.gmra.mrb[16].mxu0 %vm510_vm4, %v558_v39 }
 0x496   : > { %v600_v40 = vpop.f32.mrb[8].mxu1 }
 0x497   : > { %v927_v41 = vpop.f32.mrb[9].mxu1 }
 0x498   : > { %v603_v42 = vpop.f32.mrb[10].mxu1 }
 0x499   : > { %v928_v43 = vpop.f32.mrb[11].mxu1 }
 0x507   : > { %v646_v11 = vpop.f32.mrb[12].mxu0 }
 0x508   : > { %745 = vrot.lane.b32.xlu0 %v646_v11, %s1179_s8  ;;  %v933_v44 = vpop.f32.mrb[13].mxu0 }
 0x509   : > { %v649_v45 = vpop.f32.mrb[14].mxu0 }
 0x50a   : > { %v934_v46 = vpop.f32.mrb[15].mxu0 }
 0x50b   : > { %v692_v47 = vpop.f32.mrb[12].mxu1 }
 0x50c   : > { %749 = vrot.lane.b32.xlu1 %v692_v47, %s1180_s9  ;;  %v939_v48 = vpop.f32.mrb[13].mxu1 }
 0x50d   : > { %v695_v49 = vpop.f32.mrb[14].mxu1 }
 0x50e   : > { %v940_v50 = vpop.f32.mrb[15].mxu1 }
 0x53c   : > { %v738_v51 = vpop.f32.mrb[16].mxu0 }
 0x53d   : > { %753 = vrot.lane.b32.xlu0 %v738_v51, %s1181_s10  ;;  %v945_v52 = vpop.f32.mrb[17].mxu0 }
 0x53e   : > { %v741_v53 = vpop.f32.mrb[18].mxu0 }
 0x53f   : > { %v946_v54 = vpop.f32.mrb[19].mxu0 }
 0x57a   : > { %v746_v55 = vpop.permute.xlu0 %745 }
 0x57b   : > { %v756_v57 = vsel %vm316_vm2, %v600_v40, %v746_v55 }
 0x57e   : > { %v750_v56 = vpop.permute.xlu1 %749 }
 0x57f   : > { %v757_v58 = vsel %vm240_vm0, %v756_v57, %v750_v56 }
 0x5af   : > { %v754_v59 = vpop.permute.xlu0 %753 }
 0x5b0   : > { %v759_v60 = vsel %vm758_vm5, %v757_v58, %v754_v59 }
 0x5b1   : > { %761 = vst.msk [vmem:[%s200_s27] sm:$0xff] %vm760_vm6, %v759_v60 }
 0x5b2   : > { %1109 = shalt.err (!%p1106_p7)
}
 0x5b3   : > { %s1110_s30 = scalar_lea.hbm %s1426_s6, 128  ;;  %s1114_s26 = scalar_lea.hbm %s1473_s3, 256 }
 0x5b4   : > { %p1111_p9 = scmp.ne.s32.totalorder %s1426_s6, %s1110_s30  ;;  %p1115_p0 = scmp.lt.u32.totalorder %s1426_s6, %s1473_s3 }
 0x5b5   : > { %p1116_p11 = scmp.lt.u32.totalorder %s1114_s26, %s1110_s30  ;;  %p1118_p4 = scmp.lt.u32.totalorder %s1110_s30, %s1426_s6 }
 0x5b6   : > { %p1112_p2 = pnand %p1111_p9, %p1294_p12 }
 0x5b7   : > { %p1117_p1 = por %p1116_p11, %p1115_p0 }
 0x5b8   : > { %p1113_p5 = pneg %p1112_p2 }
 0x5b9   : > { %p1119_p6 = por %p1118_p4, %p1117_p1 }
 0x5bb   : > { %p1120_p8 = pnand %p1119_p6, %p1113_p5 }
 0x5bd   : > { %1123 = shalt.err (!%p1120_p8)
}
 0x5be   : > { %953 = dma.vmem_to_hbm [thread:$0]  (%p1294_p12), %s1428_s28, 128, %s1426_s6, %s763_s16  }
 0x5bf PF: > { %s788_s9 = sand.u32 1, %s1154_s12   ;;  %p1488_p10 = scmp.ne.s32.totalorder %s1478_s19, 0 }
 0x5c0   : > { %p1489_p13 = scmp.ge.s32.totalorder %s1166_s15, 2  ;;  %s789_s10 = scalar_lea.sflag [#allocation4], %s788_s9 }
 0x5c2   : > { %p964_p3 = pnand %p1489_p13, %p1488_p10 }
 0x5c4   : > { %1149 = dma.done.wait (!%p964_p3), %s789_s10, 128  }
 0x5c5   : > { %1151 = vsyncadd (!%p964_p3), %s789_s10, 4294967168  ;;  %p17_p7 = scmp.ge.s32.totalorder %s1259_s24, 4   ;;  %s1490_s12 = smov %s1158_s13 }
 0x5c6   : > { %s1491_s13 = smov %s1162_s14  ;;  %s1492_s14 = smov %s1290_s17 }
 0x5c7   : > { %s1493_s15 = smov %s1259_s24  ;;  %19 = sbr.rel (!%p17_p7) target bundleno = 6 (0x6), region = 81 }
 0x5ce   :  { %794 = vsyncpa [#allocation3], 1 }
 0x5cf   :  { %796 = vsyncpa [#allocation3 + $0x1], 1 }
 0x5d0   :  { %797 = vsyncpa [#allocation6], 1 }
 0x5d1   :  { %798 = vsyncpa [#allocation4], 1 }
 0x5d2   :  { %800 = vsyncpa [#allocation4 + $0x1], 1 }

</bundles_post_ra>
